<compile_context>
chip_gen: v7x
topology: tpu7x:2x2x1
jax: 0.10.0
libtpu: 0.0.40
codegen_flags: <defaults>
</compile_context>

<pallas_src>
import jax
import jax.numpy as jnp
from jax.experimental import pallas as pl
from jax.experimental.pallas import tpu as pltpu


def _round_up(x: int, m: int) -> int:
    return ((x + m - 1) // m) * m


def _choose_m_tiling(M: int, tm_target: int):
    """Pick an M tile that (a) is a multiple of 8 (sublane) or the full dim,
    (b) divides M when possible (no pad, no post-slice), and (c) yields at
    least two tiles so both v7x TensorCores get work."""
    tm_target = max(8, int(tm_target))
    if M <= 8:
        return M, M                                   # single full-dim tile (legal)
    if M % 8 == 0:
        fallback = None
        for t in range(min(M, tm_target) // 8 * 8, 7, -8):
            if M % t == 0:
                if M // t >= 2:
                    return t, M                        # largest divisor giving >= 2 tiles
                if fallback is None:
                    fallback = t
        if fallback is not None:
            return fallback, M
    tm = min(tm_target, _round_up(M, 8))
    return tm, _round_up(M, tm)


def _joiner_kernel(x_ref, w_in_ref, b_in_ref, wo_ref, bo_ref, out_ref, h_ref):
    """Fused joiner.  Grid = (M tiles, V tiles); vocab axis innermost, "arbitrary".

    The hidden tanh activation is computed once per M tile (vocab index 0) in a
    single fused MXU matmul and kept in VMEM scratch for every vocab tile.
    """
    @pl.when(pl.program_id(1) == 0)
    def _():
        h = jnp.dot(x_ref[...], w_in_ref[...], preferred_element_type=jnp.float32)
        h = h + b_in_ref[...]
        h_ref[...] = jnp.tanh(h).astype(h_ref.dtype)

    logits = jnp.dot(h_ref[...], wo_ref[...], preferred_element_type=jnp.float32)
    out_ref[...] = (logits + bo_ref[...]).astype(out_ref.dtype)


def prepare_joiner_params(params, compute_dtype=jnp.bfloat16):
    """One-time weight prep (keep outside the per-call decode path):
    fuse the two input projections into a single (enc+dec, joiner) matmul
    weight, fold their biases, cast matmul weights to the MXU compute dtype."""
    w_in = jnp.concatenate([params["we"], params["wd"]], axis=0).astype(compute_dtype)
    b_in = (params["be"].astype(jnp.float32)
            + params["bd"].astype(jnp.float32)).reshape(1, -1)
    return {
        "w_in": w_in,                                        # (enc+dec, joiner) bf16
        "b_in": b_in,                                        # (1, joiner)       f32
        "wo": params["wo"].astype(compute_dtype),            # (joiner, vocab)   bf16
        "bo": params["bo"].astype(jnp.float32).reshape(1, -1),  # (1, vocab)     f32
    }


def joiner_forward(encoder_out, decoder_out, prepared, *,
                   tm=512, compute_dtype=jnp.bfloat16, out_dtype=None):
    """encoder_out/decoder_out: (N, T, s_range, C). Returns (N, T, s_range, vocab).

    Set out_dtype=jnp.bfloat16 to halve store traffic (useful on v5e) when the
    downstream loss runs in f32 anyway; default inherits the input dtype.
    """
    N, T, S, enc_dim = encoder_out.shape
    dec_dim = decoder_out.shape[-1]
    assert encoder_out.shape[:3] == decoder_out.shape[:3]

    w_in, b_in = prepared["w_in"], prepared["b_in"]
    wo, bo = prepared["wo"], prepared["bo"]
    in_dim, joiner_dim = w_in.shape
    assert in_dim == enc_dim + dec_dim
    vocab_size = wo.shape[1]
    out_dtype = encoder_out.dtype if out_dtype is None else out_dtype

    M = N * T * S
    c_itm = jnp.dtype(compute_dtype).itemsize
    o_itm = jnp.dtype(out_dtype).itemsize

    # ---- M tiling: prefer divisors of M (no pad, no post-slice), >= 2 tiles. ----
    tm_eff, m_pad = _choose_m_tiling(M, tm)

    # ---- Fused input operand: one concat+cast pass emitting bf16 (half the
    # bytes of f32); the kernel then streams a single operand and does one dot.
    x2d = jnp.concatenate(
        [encoder_out.reshape(M, enc_dim), decoder_out.reshape(M, dec_dim)],
        axis=1).astype(compute_dtype)
    if m_pad != M:
        x2d = jnp.pad(x2d, ((0, m_pad - M), (0, 0)))

    # ---- Chip-derived VMEM budget. ----
    try:
        vmem_cap = int(pltpu.get_tpu_info().vmem_capacity_bytes)
    except Exception:
        vmem_cap = 64 << 20
    budget = int(0.55 * vmem_cap)

    def vmem_bytes(tv):
        # double-buffered pipeline allocations + hidden-activation scratch
        return 2 * (tm_eff * in_dim * c_itm
                    + in_dim * joiner_dim * c_itm
                    + joiner_dim * 4
                    + joiner_dim * tv * c_itm
                    + tv * 4
                    + tm_eff * tv * o_itm) + tm_eff * joiner_dim * c_itm

    # ---- Vocab tiling: resident wo (single unpadded tile) whenever it fits;
    # otherwise tile a 128-padded vocab. ----
    v128 = _round_up(vocab_size, 128)
    if vmem_bytes(v128) <= budget:
        tv_eff, v_pad = vocab_size, vocab_size        # resident wo, no pad, no slice
    else:
        v_pad = v128
        tv_eff = 128
        for cand in (512, 384, 256):
            if v_pad % cand == 0 and vmem_bytes(cand) <= budget:
                tv_eff = cand
                break
    if v_pad != vocab_size:
        wo = jnp.pad(wo, ((0, 0), (0, v_pad - vocab_size)))
        bo = jnp.pad(bo, ((0, 0), (0, v_pad - vocab_size)))

    grid = (m_pad // tm_eff, v_pad // tv_eff)

    in_specs = [
        pl.BlockSpec((tm_eff, in_dim), lambda i, j: (i, 0)),       # fused activations
        pl.BlockSpec((in_dim, joiner_dim), lambda i, j: (0, 0)),   # fused input weight
        pl.BlockSpec((1, joiner_dim), lambda i, j: (0, 0)),        # folded bias
        pl.BlockSpec((joiner_dim, tv_eff), lambda i, j: (0, j)),   # output weight
        pl.BlockSpec((1, tv_eff), lambda i, j: (0, j)),            # output bias
    ]
    out_spec = pl.BlockSpec((tm_eff, tv_eff), lambda i, j: (i, j))

    vmem_needed = vmem_bytes(tv_eff)
    vmem_limit = int(min(max(vmem_needed + (vmem_needed >> 2), 8 << 20),
                         max(int(0.7 * vmem_cap), vmem_needed)))

    cost = pl.CostEstimate(
        flops=2 * M * joiner_dim * (in_dim + vocab_size),
        transcendentals=M * joiner_dim,
        bytes_accessed=(M * in_dim * c_itm
                        + in_dim * joiner_dim * c_itm
                        + joiner_dim * v_pad * c_itm
                        + (joiner_dim + v_pad) * 4
                        + m_pad * v_pad * o_itm),
    )

    out2d = pl.pallas_call(
        _joiner_kernel,
        out_shape=jax.ShapeDtypeStruct((m_pad, v_pad), out_dtype),
        grid_spec=pltpu.PrefetchScalarGridSpec(
            num_scalar_prefetch=0,
            grid=grid,
            in_specs=in_specs,
            out_specs=out_spec,
            scratch_shapes=[pltpu.VMEM((tm_eff, joiner_dim), compute_dtype)],
        ),
        compiler_params=pltpu.CompilerParams(
            dimension_semantics=("parallel", "arbitrary"),
            vmem_limit_bytes=vmem_limit,
        ),
        cost_estimate=cost,
    )(x2d, w_in, b_in, wo, bo)

    if m_pad != M or v_pad != vocab_size:
        out2d = out2d[:M, :vocab_size]
    return out2d.reshape(N, T, S, vocab_size)


def init_joiner_params(key, encoder_dim, decoder_dim, joiner_dim, vocab_size,
                       dtype=jnp.float32):
    """Deterministic synthetic parameter init (shapes match ScaledLinear layers).

    Weights stored pre-transposed as (in_dim, out_dim); biases as (1, out_dim).
    """
    ks = jax.random.split(key, 6)
    scale = 0.05
    return {
        "we": (scale * jax.random.normal(ks[0], (encoder_dim, joiner_dim))).astype(dtype),
        "be": (scale * jax.random.normal(ks[1], (1, joiner_dim))).astype(dtype),
        "wd": (scale * jax.random.normal(ks[2], (decoder_dim, joiner_dim))).astype(dtype),
        "bd": (scale * jax.random.normal(ks[3], (1, joiner_dim))).astype(dtype),
        "wo": (scale * jax.random.normal(ks[4], (joiner_dim, vocab_size))).astype(dtype),
        "bo": (scale * jax.random.normal(ks[5], (1, vocab_size))).astype(dtype),
    }


def joiner_reference(encoder_out, decoder_out, params):
    """Pure-JAX f32 reference matching the PyTorch forward."""
    h = encoder_out @ params["we"] + params["be"][0]
    h = h + decoder_out @ params["wd"] + params["bd"][0]
    h = jnp.tanh(h)
    return h @ params["wo"] + params["bo"][0]


if __name__ == "__main__":
    # Small shapes consistent with the module's forward contract.
    N, T, S = 2, 8, 4            # batch, time, s_range  -> M = 64 rows
    encoder_dim = 32
    decoder_dim = 32
    joiner_dim = 32
    vocab_size = 64              # not a multiple of 128 -> exercises full-dim vocab block

    key = jax.random.PRNGKey(0)
    k_enc, k_dec, k_par = jax.random.split(key, 3)

    encoder_out = jax.random.normal(k_enc, (N, T, S, encoder_dim), dtype=jnp.float32)
    decoder_out = jax.random.normal(k_dec, (N, T, S, decoder_dim), dtype=jnp.float32)
    params = init_joiner_params(k_par, encoder_dim, decoder_dim, joiner_dim, vocab_size)

    prepared = prepare_joiner_params(params)     # one-time weight fuse/cast
    fwd = jax.jit(joiner_forward)

    out = jax.block_until_ready(fwd(encoder_out, decoder_out, prepared))

    ref = joiner_reference(encoder_out, decoder_out, params)
    assert out.shape == (N, T, S, vocab_size), out.shape
    # bf16 compute with f32 accumulation -> loosened tolerance vs f32 reference.
    assert jnp.allclose(out, ref, atol=2e-2, rtol=2e-2), float(jnp.max(jnp.abs(out - ref)))

    print("KERNEL_OK")
</pallas_src>

<mosaic_0001>
module attributes {stable_mosaic.version = 11 : i64} {
  func.func @_joiner_kernel(%arg0: i32, %arg1: i32, %arg2: memref<32x64xbf16, #tpu.memory_space<vmem>>, %arg3: memref<64x32xbf16, #tpu.memory_space<vmem>>, %arg4: memref<1x32xf32, #tpu.memory_space<vmem>>, %arg5: memref<32x64xbf16, #tpu.memory_space<vmem>>, %arg6: memref<1x64xf32, #tpu.memory_space<vmem>>, %arg7: memref<32x64xf32, #tpu.memory_space<vmem>>, %arg8: memref<32x32xbf16, #tpu.memory_space<vmem>>) attributes {dimension_semantics = [#tpu.dimension_semantics<parallel>, #tpu.dimension_semantics<arbitrary>], iteration_bounds = array<i64: 2, 1>, scalar_prefetch = 0 : i64, scratch_operands = 1 : i64, tpu.core_type = #tpu.core_type<tc>, window_params = [{transform_indices = @transform_0, window_bounds = array<i64: 32, 64>}, {pipeline_mode = #tpu.pipeline_mode<synchronous>, transform_indices = @transform_1, window_bounds = array<i64: 64, 32>}, {pipeline_mode = #tpu.pipeline_mode<synchronous>, transform_indices = @transform_2, window_bounds = array<i64: 1, 32>}, {transform_indices = @transform_3, window_bounds = array<i64: 32, 64>}, {transform_indices = @transform_4, window_bounds = array<i64: 1, 64>}, {transform_indices = @transform_5, window_bounds = array<i64: 32, 64>}]} {
    %c0_i32 = arith.constant 0 : i32
    %0 = arith.cmpi eq, %arg1, %c0_i32 : i32
    %1 = arith.extui %0 : i1 to i32
    %c0_i32_0 = arith.constant 0 : i32
    %2 = arith.cmpi ne, %1, %c0_i32_0 : i32
    scf.if %2 {
      %c0_8 = arith.constant 0 : index
      %c0_9 = arith.constant 0 : index
      %10 = vector.load %arg2[%c0_8, %c0_9] : memref<32x64xbf16, #tpu.memory_space<vmem>>, vector<32x64xbf16>
      %c0_10 = arith.constant 0 : index
      %c0_11 = arith.constant 0 : index
      %11 = vector.load %arg3[%c0_10, %c0_11] : memref<64x32xbf16, #tpu.memory_space<vmem>>, vector<64x32xbf16>
      %cst_12 = arith.constant dense<0.000000e+00> : vector<32x32xf32>
      %12 = tpu.matmul %10, %11, %cst_12 {dimension_numbers = #tpu.dot_dimension_numbers<[1], [0], [0], [1], [0, 0, 1, 1], [], []>} : vector<32x64xbf16>, vector<64x32xbf16>, vector<32x32xf32> -> vector<32x32xf32>
      %c0_13 = arith.constant 0 : index
      %c0_14 = arith.constant 0 : index
      %13 = vector.load %arg4[%c0_13, %c0_14] : memref<1x32xf32, #tpu.memory_space<vmem>>, vector<1x32xf32>
      %14 = vector.broadcast %13 : vector<1x32xf32> to vector<32x32xf32>
      %15 = arith.addf %12, %14 : vector<32x32xf32>
      %16 = math.tanh %15 : vector<32x32xf32>
      %17 = arith.truncf %16 : vector<32x32xf32> to vector<32x32xbf16>
      %c0_15 = arith.constant 0 : index
      %c0_16 = arith.constant 0 : index
      %18 = vector.load %arg8[%c0_15, %c0_16] : memref<32x32xbf16, #tpu.memory_space<vmem>>, vector<32x32xbf16>
      tpu.vector_store %arg8[%c0_15, %c0_16], %17 {strides = array<i32>} : memref<32x32xbf16, #tpu.memory_space<vmem>>, vector<32x32xbf16>,
    } else {
    }
    %c0 = arith.constant 0 : index
    %c0_1 = arith.constant 0 : index
    %3 = vector.load %arg8[%c0, %c0_1] : memref<32x32xbf16, #tpu.memory_space<vmem>>, vector<32x32xbf16>
    %c0_2 = arith.constant 0 : index
    %c0_3 = arith.constant 0 : index
    %4 = vector.load %arg5[%c0_2, %c0_3] : memref<32x64xbf16, #tpu.memory_space<vmem>>, vector<32x64xbf16>
    %cst = arith.constant dense<0.000000e+00> : vector<32x64xf32>
    %5 = tpu.matmul %3, %4, %cst {dimension_numbers = #tpu.dot_dimension_numbers<[1], [0], [0], [1], [0, 0, 1, 1], [], []>} : vector<32x32xbf16>, vector<32x64xbf16>, vector<32x64xf32> -> vector<32x64xf32>
    %c0_4 = arith.constant 0 : index
    %c0_5 = arith.constant 0 : index
    %6 = vector.load %arg6[%c0_4, %c0_5] : memref<1x64xf32, #tpu.memory_space<vmem>>, vector<1x64xf32>
    %7 = vector.broadcast %6 : vector<1x64xf32> to vector<32x64xf32>
    %8 = arith.addf %5, %7 : vector<32x64xf32>
    %c0_6 = arith.constant 0 : index
    %c0_7 = arith.constant 0 : index
    %9 = vector.load %arg7[%c0_6, %c0_7] : memref<32x64xf32, #tpu.memory_space<vmem>>, vector<32x64xf32>
    tpu.vector_store %arg7[%c0_6, %c0_7], %8 {strides = array<i32>} : memref<32x64xf32, #tpu.memory_space<vmem>>, vector<32x64xf32>,
    return
  }
  func.func @transform_0(%arg0: i32, %arg1: i32) -> (i32, i32) {
    %c0_i32 = arith.constant 0 : i32
    %c0_i32_0 = arith.constant 0 : i32
    return %arg0, %c0_i32 : i32, i32
  }
  func.func @transform_1(%arg0: i32, %arg1: i32) -> (i32, i32) {
    %c0_i32 = arith.constant 0 : i32
    %c0_i32_0 = arith.constant 0 : i32
    %c0_i32_1 = arith.constant 0 : i32
    return %c0_i32, %c0_i32_0 : i32, i32
  }
  func.func @transform_2(%arg0: i32, %arg1: i32) -> (i32, i32) {
    %c0_i32 = arith.constant 0 : i32
    %c0_i32_0 = arith.constant 0 : i32
    %c0_i32_1 = arith.constant 0 : i32
    return %c0_i32, %c0_i32_0 : i32, i32
  }
  func.func @transform_3(%arg0: i32, %arg1: i32) -> (i32, i32) {
    %c0_i32 = arith.constant 0 : i32
    %c0_i32_0 = arith.constant 0 : i32
    return %c0_i32, %arg1 : i32, i32
  }
  func.func @transform_4(%arg0: i32, %arg1: i32) -> (i32, i32) {
    %c0_i32 = arith.constant 0 : i32
    %c0_i32_0 = arith.constant 0 : i32
    return %c0_i32, %arg1 : i32, i32
  }
  func.func @transform_5(%arg0: i32, %arg1: i32) -> (i32, i32) {
    %c0_i32 = arith.constant 0 : i32
    return %arg0, %arg1 : i32, i32
  }
}

</mosaic_0001>

<bundles_post_ra>
// kernel: joiner_forward.1
= control target key start
LH: loop header
LB: loop body
LE: loop exit
PB: predicated region body
PF: predicated region fallthrough
CT: control target
= control target key end

     0   :  { %10 = vsyncpa [#allocation4], 0  ;;  %s984_s0 = inlined_call_operand.vmem [shape: bf16[64,64], index: 0, kind: input, shape index: {}]   ;;  %s985_s1 = inlined_call_operand.vmem [shape: bf16[64,32], index: 1, kind: input, shape index: {}]   ;;  %s986_s2 = inlined_call_operand.vmem [shape: f32[1,32], index: 2, kind: input, shape index: {}]   ;;  %s987_s3 = inlined_call_operand.vmem [shape: bf16[32,64], index: 3, kind: input, shape index: {}]   ;;  %s988_s4 = inlined_call_operand.vmem [shape: f32[1,64], index: 4, kind: input, shape index: {}]   ;;  %s989_s5 = inlined_call_operand.hbm [shape: f32[64,64], index: 5, kind: output, shape index: {}]  }
   0x1   :  { %12 = vsyncpa [#allocation4 + $0x1], 0  ;;  %s840_s18 = smov 0   ;;  %s842_s19 = smov 0  }
   0x2   :  { %s844_s20 = smov 0   ;;  %s846_s21 = smov 0  }
   0x3   :  { %s848_s22 = smov 0   ;;  %s850_s23 = smov 0  }
   0x4 LB: > { %s594_s24 = sadd.s32 4294967295, %s805_s23   ;;  %s595_s25 = sadd.s32 4294967294, %s805_s23   ;;  %s805_s23 = sphi %s850_s23, %s18_s23   ;;  %s801_s22 = sphi %s848_s22, %s996_s22   ;;  %s797_s21 = sphi %s846_s21, %s995_s21   ;;  %s793_s20 = sphi %s844_s20, %s994_s20   ;;  %s789_s19 = sphi %s842_s19, %s993_s19   ;;  %s785_s18 = sphi %s840_s18, %s992_s18  }
   0x5   : > { %s30_s26 = sadd.s32 1, %s801_s22  ;;  %s159_s27 = sadd.s32 1, %s793_s20 }
   0x6   : > { %p32_p0 = scmp.ge.s32.totalorder %s30_s26, 2  ;;  %p169_p1 = scmp.ne.s32.totalorder %s793_s20, %s789_s19 }
   0x7   : > { %p170_p2 = scmp.eq.s32.totalorder %s594_s24, 1  ;;  %p175_p3 = scmp.ne.s32.totalorder %s789_s19, %s785_s18 }
   0x8   : > { %s998_s26 = smov (%p32_p0, %s30_s26), 0  ;;  %p176_p5 = scmp.eq.s32.totalorder %s595_s25, 1 }
   0x9   : > { %p880_p4 = por %p170_p2, %p169_p1  ;;  %s154_s29 = ssub.s32 %s801_s22, %s998_s26 }
   0xa   : > { %p600_p6 = scmp.ge.s32.totalorder %s805_s23, 1  ;;  %p157_p7 = scmp.eq.s32.totalorder %s154_s29, 0 }
   0xb   : > { %p887_p8 = por %p176_p5, %p175_p3  ;;  %p222_p9 = scmp.lt.s32.totalorder %s805_s23, 3 }
   0xc   : > { %s893_s6 = scalar_select %p157_p7, %s793_s20, %s159_s27  }
   0xd   : > { %p223_p10 = pnand %p600_p6, %p222_p9 }
   0xe   : > { %v711_v0 = vld [vmem:[%s985_s1] sm:$0xff] (!%p223_p10)   ;;  %s602_s9 = sshll.u32 (!%p223_p10), %s797_s21, 2  ;;  %v712_v1 = vld [vmem:[%s985_s1 + $0x8] sm:$0xff] (!%p223_p10)   ;;  %v713_v2 = vld [vmem:[%s985_s1 + $0x10] sm:$0xff] (!%p223_p10)   ;;  %vm329_vm0 = vcmask (!%p223_p10), 523264   ;;  %vm391_vm1 = vcmask (!%p223_p10), 261120  }
   0xf   : > { %226 = sbr.rel (%p223_p10) target bundleno = 502 (0x1f6), region = 40  ;;  %p258_p11 = scmp.lt.s32.totalorder (!%p223_p10), %s602_s9, 7  ;;  %634 = vmatprep.subr.bf16.mxu0 (!%p223_p10), %v711_v0  ;;  %v714_v4 = vld [vmem:[%s985_s1 + $0x18] sm:$0xff] (!%p223_p10)   ;;  %v717_v6 = vld [vmem:[%s987_s3] sm:$0xff] (!%p223_p10)   ;;  %v718_v7 = vld [vmem:[%s987_s3 + $0x8] sm:$0xff] (!%p223_p10)  }
  0x10   : > { %635 = vmatpush3.bf16.msra.mxu0 (!%p223_p10), %v711_v0  ;;  %646 = vmatprep.subr.bf16.mxu1 (!%p223_p10), %v717_v6  ;;  %v604_v8 = vld [vmem:[%s986_s2] ss:$0 sm:$0xff] (!%p223_p10)  ;;  %s254_s11 = sand.u32 (!%p223_p10), 1, %s789_s19   ;;  %s807_s7 = smov (!%p223_p10), [#allocation3]  }
  0x11   : > { %636 = vmatprep.subr.bf16.mxu0 (!%p223_p10), %v712_v1  ;;  %647 = vmatpush3.bf16.msra.mxu1 (!%p223_p10), %v717_v6  ;;  %s601_s12 = sshll.u32 (!%p223_p10), %s254_s11, 5  ;;  %v613_v25 = vld [vmem:[%s988_s4] ss:$0 sm:$0xff] (!%p223_p10)  ;;  %s731_s8 = sshll.u32 (!%p223_p10), %s807_s7, 4  ;;  %s732_s8 = int_to_ptr.vmem [resolvable:$false] %s731_s8 }
  0x12   : > { %648 = vmatprep.subr.bf16.mxu1 (!%p223_p10), %v718_v7  ;;  %s256_s15 = scalar_lea.vmem (!%p223_p10), [#allocation3], %s601_s12 }
  0x13   : > { %s495_s16 = sshll.u32 (!%p223_p10), %s256_s15, 4  ;;  %s928_s16 = int_to_ptr.vmem [resolvable:$true] %s495_s16 }
  0x14   : > { %637 = vmatpush3.bf16.msra.mxu0 (!%p223_p10), %v712_v1  ;;  %s727_s29 = scalar_lea.vmem (!%p223_p10), %s928_s16, 512  ;;  %p734_p1 = scmp.lt.s32.totalorder (!%p223_p10), %s928_s16, %s732_s8 }
  0x15   : > { %638 = vmatprep.subr.bf16.mxu0 (!%p223_p10), %v713_v2  ;;  %649 = vmatpush3.bf16.msra.mxu1 (!%p223_p10), %v718_v7  ;;  %p728_p12 = scmp.ne.s32.totalorder (!%p223_p10), %s928_s16, %s727_s29 }
  0x16   : > { %s1000_s9 = smov (!%p258_p11, %s602_s9), 7 }
  0x17   : > { %s603_s14 = sshll.u32 %s1000_s9, 2  ;;  %p729_p13 = pnand %p728_p12, %p880_p4 }
  0x18   : > { %s261_s17 = scalar_lea.vmem %s984_s0, %s603_s14  ;;  %639 = vmatpush3.bf16.msra.mxu0 %v713_v2  ;;  %s733_s9 = scalar_lea.vmem %s732_s8, 1024 }
  0x19   : > { %v715_v3 = vld [vmem:[%s261_s17] sm:$0xff]   ;;  %640 = vmatprep.subr.bf16.mxu0 %v714_v4  ;;  %v716_v5 = vld [vmem:[%s261_s17 + $0x8] sm:$0xff]   ;;  %s623_s17 = sshll.u32 %s797_s21, 9  ;;  %s938_s21 = scalar_lea.sflag [#allocation4], %s254_s11 }
  0x1a   : > { %642 = vmatprep.mubr.msk.bf16.mxu0 %vm329_vm0, %v715_v3  ;;  %s933_s27 = scalar_lea.hbm %s989_s5, %s623_s17  ;;  %p730_p0 = pneg %p729_p13 }
  0x1b   : > { %p735_p2 = scmp.lt.s32.totalorder %s733_s9, %s727_s29 }
  0x1c   : > { %641 = vmatpush3.bf16.msra.mxu0 %v714_v4 }
  0x1d   : > { %p736_p3 = por %p735_p2, %p734_p1 }
  0x1f   : > { %643 = vmatmul.mubr.msk.bf16.vlgmr.msra.gmra.mrb[0].mxu0 %vm329_vm0, %v716_v5  ;;  %p737_p5 = pnand %p736_p3, %p730_p0 }
  0xf2   : > { %v644_v9 = vpop.f32.mrb[0].mxu0 }
  0xf3   : > { %v379_v10 = vadd.f32 %v644_v9, %v604_v8  ;;  %v370_v11 = vpop.f32.mrb[1].mxu0 }
  0xf4   : > { %v371_v12 = vadd.f32 %v604_v8, %v370_v11  ;;  %v645_v13 = vpop.f32.mrb[2].mxu0 }
  0xf5   : > { %719 = vtanh.f32 %v379_v10  ;;  %v382_v14 = vadd.f32 %v645_v13, %v604_v8  ;;  %v373_v15 = vpop.f32.mrb[3].mxu0 }
  0xf6   : > { %721 = vtanh.f32 %v371_v12  ;;  %v374_v16 = vadd.f32 %v604_v8, %v373_v15 }
  0xf7   : > { %723 = vtanh.f32 %v382_v14 }
  0xf8   : > { %725 = vtanh.f32 %v374_v16 }
  0xff   : > { %v720_v17 = vpop.eup %719 }
 0x100   : > { %v722_v18 = vpop.eup %721 }
 0x101   : > { %v724_v19 = vpop.eup %723 }
 0x102   : > { %v726_v20 = vpop.eup %725  ;;  %v390_v21 = vpack.c.bf16 %v724_v19, %v720_v17 }
 0x103   : > { %v389_v22 = vpack.c.bf16 %v726_v20, %v722_v18 }
 0x104   : > { %393 = vst.msk [vmem:[#allocation2 + $0x8] sm:$0xff] %vm391_vm1, %v390_v21 }
 0x105   : > { %392 = vst.msk [vmem:[#allocation2] sm:$0xff] %vm391_vm1, %v389_v22 }
 0x10b   : > { %v395_v24 = vld [vmem:[#allocation2 + $0x8] sm:$0xff] }
 0x10c   : > { %v394_v23 = vld [vmem:[#allocation2] sm:$0xff] }
 0x10d   : > { %650 = vmatprep.mubr.msk.bf16.mxu1 %vm391_vm1, %v394_v23 }
 0x10e   : > { %651 = vmatmul.mubr.msk.bf16.vlgmr.msra.gmra.mrb[0].mxu1 %vm391_vm1, %v395_v24 }
 0x1e1   : > { %v652_v26 = vpop.f32.mrb[0].mxu1 }
 0x1e2   : > { %v469_v27 = vadd.f32 %v652_v26, %v613_v25  ;;  %v460_v28 = vpop.f32.mrb[1].mxu1 }
 0x1e3   : > { %v461_v29 = vadd.f32 %v613_v25, %v460_v28  ;;  %v653_v30 = vpop.f32.mrb[2].mxu1 }
 0x1e4   : > { %478 = vst.msk [vmem:[%s256_s15 + $0x10] sm:$0xff] %vm329_vm0, %v469_v27  ;;  %v472_v31 = vadd.f32 %v653_v30, %v613_v25  ;;  %v463_v32 = vpop.f32.mrb[3].mxu1 }
 0x1e5   : > { %476 = vst.msk [vmem:[%s256_s15] sm:$0xff] %vm329_vm0, %v461_v29  ;;  %v464_v33 = vadd.f32 %v613_v25, %v463_v32 }
 0x1e6   : > { %479 = vst.msk [vmem:[%s256_s15 + $0x18] sm:$0xff] %vm329_vm0, %v472_v31 }
 0x1e7   : > { %477 = vst.msk [vmem:[%s256_s15 + $0x8] sm:$0xff] %vm329_vm0, %v464_v33 }
 0x1e8   : > { %740 = shalt.err (!%p737_p5)
}
 0x1e9   : > { %s741_s10 = scalar_lea.hbm %s933_s27, 512  ;;  %s745_s13 = scalar_lea.hbm %s989_s5, 1024 }
 0x1ea   : > { %p742_p6 = scmp.ne.s32.totalorder %s933_s27, %s741_s10  ;;  %p746_p10 = scmp.lt.u32.totalorder %s933_s27, %s989_s5 }
 0x1eb   : > { %p747_p11 = scmp.lt.u32.totalorder %s745_s13, %s741_s10  ;;  %p749_p13 = scmp.lt.u32.totalorder %s741_s10, %s933_s27 }
 0x1ec   : > { %p743_p7 = pnand %p742_p6, %p880_p4 }
 0x1ed   : > { %p748_p12 = por %p747_p11, %p746_p10 }
 0x1ee   : > { %p744_p9 = pneg %p743_p7 }
 0x1ef   : > { %p750_p0 = por %p749_p13, %p748_p12 }
 0x1f1   : > { %p751_p1 = pnand %p750_p0, %p744_p9 }
 0x1f3   : > { %754 = shalt.err (!%p751_p1)
}
 0x1f4   : > { %s808_s17 = smov 128   ;;  %s809_s24 = smov 8  }
 0x1f5   : > { %654 = dma.vmem_to_hbm [thread:$0]  (%p880_p4), %s928_s16, 512, %s933_s27, %s938_s21, %s808_s17, %s808_s17, %s809_s24  }
 0x1f6 PF: > { %p660_p2 = scmp.ge.s32.totalorder %s805_s23, 2  ;;  %s510_s25 = sand.u32 1, %s785_s18  }
 0x1f7   : > { %s511_s29 = scalar_lea.sflag [#allocation4], %s510_s25 }
 0x1f8   : > { %p657_p3 = pnand %p660_p2, %p887_p8 }
 0x1fa   : > { %780 = dma.done.wait (!%p657_p3), %s511_s29, 512  }
 0x1fb   : > { %782 = vsyncadd (!%p657_p3), %s511_s29, 4294966784  ;;  %s18_s23 = sadd.s32 1, %s805_s23   ;;  %s992_s18 = smov %s789_s19 }
 0x1fc   : > { %p15_p5 = scmp.ge.s32.totalorder %s18_s23, 4   ;;  %s993_s19 = smov %s793_s20 }
 0x1fd   : > { %s994_s20 = smov %s893_s6  ;;  %s995_s21 = smov %s801_s22 }
 0x1fe   : > { %s996_s22 = smov %s998_s26  ;;  %17 = sbr.rel (!%p15_p5) target bundleno = 4 (0x4), region = 85 }
 0x205   :  { %516 = vsyncpa [#allocation4], 1 }
 0x206   :  { %518 = vsyncpa [#allocation4 + $0x1], 1 }

</bundles_post_ra>
